<compile_context>
chip_gen: v5e
topology: v5e:2x2
jax: 0.10.0
libtpu: 0.0.40
codegen_flags: <defaults>
</compile_context>

<pallas_src>
import jax
import jax.numpy as jnp
from jax.experimental import pallas as pl
from jax.experimental.pallas import tpu as pltpu

LANE = 128        # lane width (last dim of every tile)
CHUNK_ROWS = 512  # rows folded per inner-loop step (256 KiB f32 temporaries)


def _round_up(a, b):
    return (a + b - 1) // b * b


def _sublane_gran(dt):
    # second-minor tile granularity: f32 -> 8, bf16 -> 16, int8 -> 32
    return max(8, 32 // jnp.dtype(dt).itemsize)


def _chip_params():
    """Return (max tile rows, #parallel splits) per TPU generation."""
    try:
        kind = jax.devices()[0].device_kind.lower()
    except Exception:
        kind = ""
    if "v7" in kind:   # 2 TensorCores / chip, 32 MiB default scoped VMEM
        return 8192, 2
    if "v6" in kind:   # 1 TC, 32 MiB default scoped VMEM
        return 8192, 1
    # v5e and older / unknown: 16 MiB default scoped VMEM, single TC.
    return 4096, 1


def _make_dice_kernel(tr, chunk, tiles_per_split, n_tiles, rows,
                      needs_row_mask, may_duplicate):
    num_chunks = tr // chunk

    def kernel(x_ref, t_ref, out_ref):
        i = pl.program_id(1)   # row-tile index ("arbitrary" / reduction axis)

        @pl.when(i == 0)
        def _init():
            out_ref[...] = jnp.zeros_like(out_ref)

        ti = pl.program_id(0) * tiles_per_split + i   # global tile index

        def accumulate(masked):
            zero = jnp.zeros((8, LANE), jnp.float32)

            def chunk_sum(c, carry):
                inter_acc, denom_acc = carry
                off = c * chunk
                if not isinstance(off, int):
                    off = pl.multiple_of(off, chunk)
                x = x_ref[pl.ds(off, chunk), :].astype(jnp.float32)
                t = t_ref[pl.ds(off, chunk), :].astype(jnp.float32)
                # sigmoid(x) = 0.5*(tanh(x/2)+1): one EUP op per vreg.
                s = 0.5 * jnp.tanh(0.5 * x) + 0.5
                if masked:
                    row = (ti * tr + off
                           + jax.lax.broadcasted_iota(jnp.int32,
                                                      (chunk, LANE), 0))
                    valid = row < rows
                    s = jnp.where(valid, s, 0.0)
                    t = jnp.where(valid, t, 0.0)
                # Fold (chunk,128) -> (8,128) with pure VPU adds; the single
                # cross-lane reduction to scalars happens once in the wrapper.
                inter_acc = inter_acc + jnp.sum(
                    (s * t).reshape(chunk // 8, 8, LANE), axis=0)
                denom_acc = denom_acc + jnp.sum(
                    (s + t).reshape(chunk // 8, 8, LANE), axis=0)
                return inter_acc, denom_acc

            if num_chunks == 1:
                inter, denom = chunk_sum(0, (zero, zero))
            else:
                inter, denom = jax.lax.fori_loop(
                    0, num_chunks, chunk_sum, (zero, zero))
            out_ref[0, 0] += inter
            out_ref[0, 1] += denom

        def run_tile():
            if not needs_row_mask:
                accumulate(False)          # fast path: no mask anywhere
            elif n_tiles == 1:
                accumulate(True)           # single (partial) tile
            else:
                @pl.when(ti == n_tiles - 1)
                def _boundary():
                    accumulate(True)       # only the boundary tile is masked

                @pl.when(ti != n_tiles - 1)
                def _interior():
                    accumulate(False)

        if may_duplicate:
            # Clamped duplicate tiles (ti >= n_tiles) skip the whole body.
            @pl.when(ti < n_tiles)
            def _valid():
                run_tile()
        else:
            run_tile()

    return kernel


def _prep(a):
    a = a.reshape(-1)
    if a.dtype == jnp.bool_:
        # Keep narrow in HBM; the in-kernel .astype(f32) widens for free.
        a = a.astype(jnp.bfloat16)
    return a


@jax.jit
def dice_loss(inputs, targets):
    """Pallas implementation of DiceLoss.forward(inputs, targets)."""
    x = _prep(inputs)
    t = _prep(targets)
    n = x.shape[0]
    rows = n // LANE
    rem = n - rows * LANE

    inter = jnp.float32(0.0)
    denom = jnp.float32(0.0)

    if rows > 0:
        tr_max, dflt_splits = _chip_params()
        g = max(_sublane_gran(x.dtype), _sublane_gran(t.dtype))
        if rows <= CHUNK_ROWS:
            tr = _round_up(rows, g)
            chunk = tr
        else:
            tr = min(tr_max, _round_up(rows, CHUNK_ROWS))
            chunk = CHUNK_ROWS
        n_tiles = -(-rows // tr)
        num_splits = dflt_splits if n_tiles >= dflt_splits else 1
        tiles_per_split = -(-n_tiles // num_splits)
        may_duplicate = num_splits * tiles_per_split != n_tiles
        needs_row_mask = (rows % tr) != 0

        # 128-aligned prefix only; the reshape is a bitcast.
        # TODO(synk): the prefix slice may still copy for unaligned sizes; a
        # manual-DMA (pl.ANY) path could avoid it, not worth it here.
        x2 = x[:rows * LANE].reshape(rows, LANE)
        t2 = t[:rows * LANE].reshape(rows, LANE)

        kernel = _make_dice_kernel(tr, chunk, tiles_per_split, n_tiles, rows,
                                   needs_row_mask, may_duplicate)

        def in_map(j, i):
            # Clamp so the grid never requests a fully out-of-range block; the
            # in-kernel pl.when skips any duplicated tile's contribution.
            return (jnp.minimum(j * tiles_per_split + i, n_tiles - 1), 0)

        partials = pl.pallas_call(
            kernel,
            out_shape=jax.ShapeDtypeStruct((num_splits, 2, 8, LANE),
                                           jnp.float32),
            grid_spec=pltpu.PrefetchScalarGridSpec(
                num_scalar_prefetch=0,
                grid=(num_splits, tiles_per_split),
                in_specs=[pl.BlockSpec((tr, LANE), in_map),
                          pl.BlockSpec((tr, LANE), in_map)],
                out_specs=pl.BlockSpec((1, 2, 8, LANE),
                                       lambda j, i: (j, 0, 0, 0)),
            ),
            compiler_params=pltpu.CompilerParams(
                dimension_semantics=("parallel", "arbitrary")),
        )(x2, t2)

        inter = inter + jnp.sum(partials[:, 0])
        denom = denom + jnp.sum(partials[:, 1])

    if rem > 0:
        # Sub-128 tail: O(128) plain-JAX work instead of padding both full
        # inputs through HBM.
        xt = x[rows * LANE:].astype(jnp.float32)
        tt = t[rows * LANE:].astype(jnp.float32)
        st = jax.nn.sigmoid(xt)
        inter = inter + jnp.sum(st * tt)
        denom = denom + jnp.sum(st) + jnp.sum(tt)

    dice = (2.0 * inter + 1.0) / (denom + 1.0)
    return 1.0 - dice


def dice_loss_ref(inputs, targets):
    """Pure-JAX reference mirroring the PyTorch module."""
    s = jax.nn.sigmoid(inputs.reshape(-1).astype(jnp.float32))
    t = targets.reshape(-1).astype(jnp.float32)
    inter = jnp.sum(s * t)
    dice = (2.0 * inter + 1.0) / (jnp.sum(s) + jnp.sum(t) + 1.0)
    return 1.0 - dice


if __name__ == "__main__":
    key = jax.random.PRNGKey(0)
    k_in, k_tg = jax.random.split(key)

    # Primary check: segmentation logits (NCHW) + binary masks, 128-aligned.
    inputs = jax.random.normal(k_in, (2, 4, 16, 16), dtype=jnp.float32)
    targets = (jax.random.uniform(k_tg, (2, 4, 16, 16)) > 0.5).astype(jnp.float32)
    loss = dice_loss(inputs, targets)
    jax.block_until_ready(loss)
    ref = dice_loss_ref(inputs, targets)
    assert jnp.allclose(loss, ref, atol=1e-4, rtol=1e-4), (loss, ref)

    # Non-128-aligned size: partial last tile (row mask) + sub-128 JAX tail.
    k2_in, k2_tg = jax.random.split(jax.random.PRNGKey(1))
    shape2 = (4, 4, 129, 161)
    inputs2 = jax.random.normal(k2_in, shape2, dtype=jnp.float32)
    targets2 = (jax.random.uniform(k2_tg, shape2) > 0.5).astype(jnp.float32)
    loss2 = dice_loss(inputs2, targets2)
    jax.block_until_ready(loss2)
    ref2 = dice_loss_ref(inputs2, targets2)
    assert jnp.allclose(loss2, ref2, atol=1e-4, rtol=1e-4), (loss2, ref2)

    # Bool masks: wrapper keeps them narrow (bf16) in HBM, widened in-kernel.
    targets3 = jax.random.uniform(k2_tg, (2, 4, 16, 16)) > 0.5
    loss3 = dice_loss(inputs, targets3)
    jax.block_until_ready(loss3)
    ref3 = dice_loss_ref(inputs, targets3.astype(jnp.float32))
    assert jnp.allclose(loss3, ref3, atol=1e-4, rtol=1e-4), (loss3, ref3)

    print("KERNEL_OK")
</pallas_src>

<mosaic_0001>
module attributes {stable_mosaic.version = 11 : i64} {
  func.func @kernel(%arg0: i32, %arg1: i32, %arg2: memref<16x128xf32, #tpu.memory_space<vmem>>, %arg3: memref<16x128xf32, #tpu.memory_space<vmem>>, %arg4: memref<1x2x8x128xf32, #tpu.memory_space<vmem>>) attributes {dimension_semantics = [#tpu.dimension_semantics<parallel>, #tpu.dimension_semantics<arbitrary>], iteration_bounds = array<i64: 1, 1>, scalar_prefetch = 0 : i64, scratch_operands = 0 : i64, tpu.core_type = #tpu.core_type<tc>, window_params = [{transform_indices = @transform_0, window_bounds = array<i64: 16, 128>}, {transform_indices = @transform_1, window_bounds = array<i64: 16, 128>}, {transform_indices = @transform_2, window_bounds = array<i64: 1, 2, 8, 128>}]} {
    %c0_i32 = arith.constant 0 : i32
    %0 = arith.cmpi eq, %arg1, %c0_i32 : i32
    %1 = arith.extui %0 : i1 to i32
    %c0_i32_0 = arith.constant 0 : i32
    %2 = arith.cmpi ne, %1, %c0_i32_0 : i32
    scf.if %2 {
      %cst_24 = arith.constant 0.000000e+00 : f32
      %33 = vector.broadcast %cst_24 : f32 to vector<1x2x8x128xf32>
      %c0_25 = arith.constant 0 : index
      %c0_26 = arith.constant 0 : index
      %c0_27 = arith.constant 0 : index
      %c0_28 = arith.constant 0 : index
      %34 = vector.load %arg4[%c0_25, %c0_26, %c0_27, %c0_28] : memref<1x2x8x128xf32, #tpu.memory_space<vmem>>, vector<1x2x8x128xf32>
      tpu.vector_store %arg4[%c0_25, %c0_26, %c0_27, %c0_28], %33 {strides = array<i32>} : memref<1x2x8x128xf32, #tpu.memory_space<vmem>>, vector<1x2x8x128xf32>,
    } else {
    }
    %cst = arith.constant 0.000000e+00 : f32
    %3 = vector.broadcast %cst : f32 to vector<8x128xf32>
    %c0 = arith.constant 0 : index
    %c0_1 = arith.constant 0 : index
    %4 = vector.load %arg2[%c0, %c0_1] : memref<16x128xf32, #tpu.memory_space<vmem>>, vector<16x128xf32>
    %c0_2 = arith.constant 0 : index
    %c0_3 = arith.constant 0 : index
    %5 = vector.load %arg3[%c0_2, %c0_3] : memref<16x128xf32, #tpu.memory_space<vmem>>, vector<16x128xf32>
    %cst_4 = arith.constant 5.000000e-01 : f32
    %6 = vector.broadcast %cst_4 : f32 to vector<16x128xf32>
    %7 = arith.mulf %6, %4 : vector<16x128xf32>
    %8 = math.tanh %7 : vector<16x128xf32>
    %cst_5 = arith.constant 5.000000e-01 : f32
    %9 = vector.broadcast %cst_5 : f32 to vector<16x128xf32>
    %10 = arith.mulf %9, %8 : vector<16x128xf32>
    %cst_6 = arith.constant 5.000000e-01 : f32
    %11 = vector.broadcast %cst_6 : f32 to vector<16x128xf32>
    %12 = arith.addf %10, %11 : vector<16x128xf32>
    %13 = arith.mulf %12, %5 : vector<16x128xf32>
    %14 = vector.shape_cast %13 : vector<16x128xf32> to vector<2x8x128xf32>
    %cst_7 = arith.constant dense<0.000000e+00> : vector<8x128xf32>
    %15 = vector.multi_reduction <add>, %14, %cst_7 [0] : vector<2x8x128xf32> to vector<8x128xf32>
    %16 = arith.addf %3, %15 : vector<8x128xf32>
    %17 = arith.addf %12, %5 : vector<16x128xf32>
    %18 = vector.shape_cast %17 : vector<16x128xf32> to vector<2x8x128xf32>
    %cst_8 = arith.constant dense<0.000000e+00> : vector<8x128xf32>
    %19 = vector.multi_reduction <add>, %18, %cst_8 [0] : vector<2x8x128xf32> to vector<8x128xf32>
    %20 = arith.addf %3, %19 : vector<8x128xf32>
    %c0_9 = arith.constant 0 : index
    %c0_10 = arith.constant 0 : index
    %c0_11 = arith.constant 0 : index
    %c0_12 = arith.constant 0 : index
    %21 = vector.load %arg4[%c0_9, %c0_10, %c0_11, %c0_12] : memref<1x2x8x128xf32, #tpu.memory_space<vmem>>, vector<1x1x8x128xf32>
    %22 = vector.shape_cast %21 : vector<1x1x8x128xf32> to vector<8x128xf32>
    %23 = arith.addf %22, %16 : vector<8x128xf32>
    %c0_13 = arith.constant 0 : index
    %c0_14 = arith.constant 0 : index
    %c0_15 = arith.constant 0 : index
    %c0_16 = arith.constant 0 : index
    %24 = vector.load %arg4[%c0_13, %c0_14, %c0_15, %c0_16] : memref<1x2x8x128xf32, #tpu.memory_space<vmem>>, vector<1x1x8x128xf32>
    %25 = vector.shape_cast %24 : vector<1x1x8x128xf32> to vector<8x128xf32>
    %26 = vector.shape_cast %23 : vector<8x128xf32> to vector<1x1x8x128xf32>
    tpu.vector_store %arg4[%c0_13, %c0_14, %c0_15, %c0_16], %26 {strides = array<i32>} : memref<1x2x8x128xf32, #tpu.memory_space<vmem>>, vector<1x1x8x128xf32>,
    %c0_17 = arith.constant 0 : index
    %c1 = arith.constant 1 : index
    %c0_18 = arith.constant 0 : index
    %c0_19 = arith.constant 0 : index
    %27 = vector.load %arg4[%c0_17, %c1, %c0_18, %c0_19] : memref<1x2x8x128xf32, #tpu.memory_space<vmem>>, vector<1x1x8x128xf32>
    %28 = vector.shape_cast %27 : vector<1x1x8x128xf32> to vector<8x128xf32>
    %29 = arith.addf %28, %20 : vector<8x128xf32>
    %c0_20 = arith.constant 0 : index
    %c1_21 = arith.constant 1 : index
    %c0_22 = arith.constant 0 : index
    %c0_23 = arith.constant 0 : index
    %30 = vector.load %arg4[%c0_20, %c1_21, %c0_22, %c0_23] : memref<1x2x8x128xf32, #tpu.memory_space<vmem>>, vector<1x1x8x128xf32>
    %31 = vector.shape_cast %30 : vector<1x1x8x128xf32> to vector<8x128xf32>
    %32 = vector.shape_cast %29 : vector<8x128xf32> to vector<1x1x8x128xf32>
    tpu.vector_store %arg4[%c0_20, %c1_21, %c0_22, %c0_23], %32 {strides = array<i32>} : memref<1x2x8x128xf32, #tpu.memory_space<vmem>>, vector<1x1x8x128xf32>,
    return
  }
  func.func @transform_0(%arg0: i32, %arg1: i32) -> (i32, i32) {
    %c1_i32 = arith.constant 1 : i32
    %0 = arith.muli %arg0, %c1_i32 : i32
    %1 = arith.addi %0, %arg1 : i32
    %c0_i32 = arith.constant 0 : i32
    %2 = arith.minsi %1, %c0_i32 : i32
    %c0_i32_0 = arith.constant 0 : i32
    %c0_i32_1 = arith.constant 0 : i32
    return %2, %c0_i32_0 : i32, i32
  }
  func.func @transform_1(%arg0: i32, %arg1: i32) -> (i32, i32) {
    %c1_i32 = arith.constant 1 : i32
    %0 = arith.muli %arg0, %c1_i32 : i32
    %1 = arith.addi %0, %arg1 : i32
    %c0_i32 = arith.constant 0 : i32
    %2 = arith.minsi %1, %c0_i32 : i32
    %c0_i32_0 = arith.constant 0 : i32
    %c0_i32_1 = arith.constant 0 : i32
    return %2, %c0_i32_0 : i32, i32
  }
  func.func @transform_2(%arg0: i32, %arg1: i32) -> (i32, i32, i32, i32) {
    %c0_i32 = arith.constant 0 : i32
    %c0_i32_0 = arith.constant 0 : i32
    %c0_i32_1 = arith.constant 0 : i32
    %c0_i32_2 = arith.constant 0 : i32
    return %arg0, %c0_i32, %c0_i32_0, %c0_i32_1 : i32, i32, i32, i32
  }
}

</mosaic_0001>

<bundles_post_ra>
// kernel: dice_loss.1
= control target key start
LH: loop header
LB: loop body
LE: loop exit
PB: predicated region body
PF: predicated region fallthrough
CT: control target
= control target key end

     0   :  { %s164_s0 = inlined_call_operand.vmem [shape: f32[16,128], index: 0, kind: input, shape index: {}]   ;;  %s165_s1 = inlined_call_operand.vmem [shape: f32[16,128], index: 1, kind: input, shape index: {}]   ;;  %s166_s2 = inlined_call_operand.vmem [shape: f32[1,2,8,128], index: 2, kind: output, shape index: {}]  }
   0x1   :  { %v81_v0 = vld [vmem:[%s164_s0] sm:$0xff]  ;;  %v82_v1 = vld [vmem:[%s164_s0 + $0x8] sm:$0xff] }
   0x2   :  { %v85_v2 = vmul.f32 0.5, %v81_v0  ;;  %v86_v3 = vmul.f32 0.5, %v82_v1  ;;  %v83_v7 = vld [vmem:[%s165_s1] sm:$0xff]  ;;  %v84_v9 = vld [vmem:[%s165_s1 + $0x8] sm:$0xff] }
   0x4   :  { %127 = vtanh.f32 %v85_v2 }
   0x5   :  { %129 = vtanh.f32 %v86_v3 }
   0xa   :  { %v128_v4 = vpop.eup %127 }
   0xb   :  { %v130_v5 = vpop.eup %129  ;;  %v89_v6 = vmul.f32 0.5, %v128_v4 }
   0xc   :  { %v90_v8 = vmul.f32 0.5, %v130_v5 }
   0xd   :  { %v91_v10 = vadd.f32 0.5, %v89_v6 }
   0xe   :  { %v92_v11 = vadd.f32 0.5, %v90_v8 }
   0xf   :  { %v93_v12 = vmul.f32 %v91_v10, %v83_v7  ;;  %v97_v13 = vadd.f32 %v91_v10, %v83_v7 }
  0x10   :  { %v94_v14 = vmul.f32 %v92_v11, %v84_v9  ;;  %v98_v15 = vadd.f32 %v92_v11, %v84_v9 }
  0x12   :  { %v95_v16 = vadd.f32 %v94_v14, %v93_v12  ;;  %v99_v17 = vadd.f32 %v98_v15, %v97_v13 }
  0x14   :  { %103 = vst [vmem:[%s166_s2] sm:$0xff] %v95_v16 }
  0x15   :  { %125 = vst [vmem:[%s166_s2 + $0x8] sm:$0xff] %v99_v17 }

</bundles_post_ra>
